<compile_context>
chip_gen: v5e
topology: v5e:2x2
jax: 0.10.0
libtpu: 0.0.40
codegen_flags: <defaults>
</compile_context>

<pallas_src>
import jax
import jax.numpy as jnp
from jax.experimental import pallas as pl
from jax.experimental.pallas import tpu as pltpu


def _make_kernel(C):
    def kernel(xa_ref, w_ref, o_ref):
        xa = xa_ref[...]            # (C+1, N) f32; last row is ones (bias input)
        w = w_ref[...]              # (3C, C+1) bf16; rows = [Wg|bg ; Wt|bt ; Wp|bp]

        # --- fused projections (+ bias via the ones row): one MXU matmul
        proj = jnp.dot(w, xa.astype(jnp.bfloat16),
                       preferred_element_type=jnp.float32)          # (3C, N)
        g = proj[0 * C:1 * C]        # (C, N)
        theta = proj[1 * C:2 * C]    # (C, N)
        phi = proj[2 * C:3 * C]      # (C, N)

        # --- spatial softmax over N (torch dim=-1): lane reduce, f32
        theta = theta - jnp.max(theta, axis=-1, keepdims=True)
        te = jnp.exp(theta)
        theta_sm = te * pl.reciprocal(jnp.sum(te, axis=-1, keepdims=True),
                                      approx=True)

        # --- similarity: (C, N) @ (N, C) -> (C, C), bf16 operands / f32 acc
        sim = jax.lax.dot_general(
            phi.astype(jnp.bfloat16), theta_sm.astype(jnp.bfloat16),
            dimension_numbers=(((1,), (1,)), ((), ())),
            preferred_element_type=jnp.float32)

        # --- channel softmax (torch dim=1): one sublane reduce per column;
        #     exact per-batch maximum since this block is exactly one batch.
        gmax = jnp.max(g, axis=0, keepdims=True)
        ge = jnp.exp(g - gmax)
        g_sm = ge * pl.reciprocal(jnp.sum(ge, axis=0, keepdims=True),
                                  approx=True)

        # --- attention + residual + LeakyReLU(0.1); lane-dense unmasked store
        attn = jnp.dot(sim.astype(jnp.bfloat16), g_sm.astype(jnp.bfloat16),
                       preferred_element_type=jnp.float32)           # (C, N)
        v = xa[:C] + attn
        o_ref[...] = jnp.where(v >= 0, v, 0.1 * v)

    return kernel


def make_selfattention(wg, bg, wt, bt, wp, bp):
    """Precomputes the fused projection weight ONCE (hoisted out of the
    per-call path per the perf review) and returns an apply(x) closure."""
    C = wg.shape[0]

    # Fused weights with folded bias column: (3C, C+1), bf16 for the MXU.
    w_all = jnp.concatenate(
        [jnp.concatenate([w.astype(jnp.float32),
                          b.astype(jnp.float32)[:, None]], axis=1)
         for w, b in ((wg, bg), (wt, bt), (wp, bp))],
        axis=0).astype(jnp.bfloat16)                                  # (3C, C+1)

    kernel = _make_kernel(C)

    def apply(x_nchw):
        B, C_, H, W = x_nchw.shape
        assert C_ == C
        N = H * W

        # (B, C, N) activations; append a ones row so the bias rides the matmul.
        x3 = x_nchw.reshape(B, C, N).astype(jnp.float32)
        xa = jnp.concatenate([x3, jnp.ones((B, 1, N), jnp.float32)], axis=1)

        out = pl.pallas_call(
            kernel,
            out_shape=jax.ShapeDtypeStruct((B, C, N), jnp.float32),
            grid=(B,),
            in_specs=[
                # One batch per grid step; batch dim squeezed out of the block.
                pl.BlockSpec((None, C + 1, N), lambda b: (b, 0, 0)),
                # Shared weights: constant index_map -> stays VMEM-resident.
                pl.BlockSpec((3 * C, C + 1), lambda b: (0, 0)),
            ],
            out_specs=pl.BlockSpec((None, C, N), lambda b: (b, 0, 0)),
            compiler_params=pltpu.CompilerParams(
                # Batch axis is independent -> shard across v7x's two TCs.
                dimension_semantics=("parallel",)),
        )(xa, w_all)
        return out.reshape(B, C, H, W)

    return apply


def _reference(x_nchw, wg, bg, wt, bt, wp, bp):
    B, C, H, W = x_nchw.shape
    N = H * W
    x = x_nchw.reshape(B, C, N)
    g_y = jnp.einsum('oc,bcn->bon', wg, x) + bg[None, :, None]
    theta = jnp.einsum('oc,bcn->bon', wt, x) + bt[None, :, None]
    phi = jnp.einsum('oc,bcn->bon', wp, x) + bp[None, :, None]
    theta_sm = jax.nn.softmax(theta, axis=-1)
    sim = jnp.einsum('bcn,bdn->bcd', phi, theta_sm)
    g_sm = jax.nn.softmax(g_y, axis=1)
    attn = jnp.einsum('bcd,bdn->bcn', sim, g_sm)
    y = x + attn
    y = jnp.where(y >= 0, y, 0.1 * y)
    return y.reshape(B, C, H, W)


if __name__ == "__main__":
    B, C, H, W = 2, 4, 16, 16
    key = jax.random.PRNGKey(0)
    kx, kwg, kbg, kwt, kbt, kwp, kbp = jax.random.split(key, 7)

    x = jax.random.normal(kx, (B, C, H, W), dtype=jnp.float32)
    bound = 1.0 / (C ** 0.5)
    wg = jax.random.uniform(kwg, (C, C), jnp.float32, -bound, bound)
    bg = jax.random.uniform(kbg, (C,), jnp.float32, -bound, bound)
    wt = jax.random.uniform(kwt, (C, C), jnp.float32, -bound, bound)
    bt = jax.random.uniform(kbt, (C,), jnp.float32, -bound, bound)
    wp = jax.random.uniform(kwp, (C, C), jnp.float32, -bound, bound)
    bp = jax.random.uniform(kbp, (C,), jnp.float32, -bound, bound)

    attn_fn = make_selfattention(wg, bg, wt, bt, wp, bp)
    y = jax.block_until_ready(attn_fn(x))

    y_ref = _reference(x, wg, bg, wt, bt, wp, bp)
    # Tolerance accounts for bf16 MXU operands (f32 accumulation) and the
    # approx (EUP) reciprocals in the two softmax normalizations.
    assert jnp.allclose(y, y_ref, atol=5e-2, rtol=5e-2), "mismatch vs reference"

    print("KERNEL_OK")
</pallas_src>

<mosaic_0001>
module attributes {stable_mosaic.version = 11 : i64} {
  func.func @kernel(%arg0: i32, %arg1: memref<1x5x256xf32, #tpu.memory_space<vmem>>, %arg2: memref<12x5xbf16, #tpu.memory_space<vmem>>, %arg3: memref<1x4x256xf32, #tpu.memory_space<vmem>>) attributes {dimension_semantics = [#tpu.dimension_semantics<parallel>], iteration_bounds = array<i64: 2>, scalar_prefetch = 0 : i64, scratch_operands = 0 : i64, tpu.core_type = #tpu.core_type<tc>, window_params = [{transform_indices = @transform_0, window_bounds = array<i64: 1, 5, 256>}, {pipeline_mode = #tpu.pipeline_mode<synchronous>, transform_indices = @transform_1, window_bounds = array<i64: 12, 5>}, {transform_indices = @transform_2, window_bounds = array<i64: 1, 4, 256>}]} {
    %c0 = arith.constant 0 : index
    %c0_0 = arith.constant 0 : index
    %c0_1 = arith.constant 0 : index
    %0 = vector.load %arg1[%c0, %c0_0, %c0_1] : memref<1x5x256xf32, #tpu.memory_space<vmem>>, vector<1x5x256xf32>
    %1 = vector.shape_cast %0 : vector<1x5x256xf32> to vector<5x256xf32>
    %c0_2 = arith.constant 0 : index
    %c0_3 = arith.constant 0 : index
    %2 = vector.load %arg2[%c0_2, %c0_3] : memref<12x5xbf16, #tpu.memory_space<vmem>>, vector<12x5xbf16>
    %3 = arith.truncf %1 : vector<5x256xf32> to vector<5x256xbf16>
    %cst = arith.constant dense<0.000000e+00> : vector<12x256xf32>
    %4 = tpu.matmul %2, %3, %cst {dimension_numbers = #tpu.dot_dimension_numbers<[1], [0], [0], [1], [0, 0, 1, 1], [], []>} : vector<12x5xbf16>, vector<5x256xbf16>, vector<12x256xf32> -> vector<12x256xf32>
    %5 = vector.extract_strided_slice %4 {offsets = [0, 0], sizes = [4, 256], strides = [1, 1]} : vector<12x256xf32> to vector<4x256xf32>
    %6 = vector.extract_strided_slice %4 {offsets = [4, 0], sizes = [4, 256], strides = [1, 1]} : vector<12x256xf32> to vector<4x256xf32>
    %7 = vector.extract_strided_slice %4 {offsets = [8, 0], sizes = [4, 256], strides = [1, 1]} : vector<12x256xf32> to vector<4x256xf32>
    %cst_4 = arith.constant dense<0xFF800000> : vector<4xf32>
    %8 = vector.multi_reduction <maximumf>, %6, %cst_4 [1] : vector<4x256xf32> to vector<4xf32>
    %9 = vector.shape_cast %8 : vector<4xf32> to vector<4x1xf32>
    %10 = vector.broadcast %9 : vector<4x1xf32> to vector<4x256xf32>
    %11 = arith.subf %6, %10 : vector<4x256xf32>
    %12 = math.exp %11 : vector<4x256xf32>
    %cst_5 = arith.constant dense<0.000000e+00> : vector<4xf32>
    %13 = vector.multi_reduction <add>, %12, %cst_5 [1] : vector<4x256xf32> to vector<4xf32>
    %14 = vector.shape_cast %13 : vector<4xf32> to vector<4x1xf32>
    %15 = tpu.reciprocal %14 {approx = true} : vector<4x1xf32> -> vector<4x1xf32>
    %16 = vector.broadcast %15 : vector<4x1xf32> to vector<4x256xf32>
    %17 = arith.mulf %12, %16 : vector<4x256xf32>
    %18 = arith.truncf %7 : vector<4x256xf32> to vector<4x256xbf16>
    %19 = arith.truncf %17 : vector<4x256xf32> to vector<4x256xbf16>
    %cst_6 = arith.constant dense<0.000000e+00> : vector<4x4xf32>
    %20 = tpu.matmul %18, %19, %cst_6 {dimension_numbers = #tpu.dot_dimension_numbers<[1], [1], [0], [0], [0, 0, 1, 0], [], []>} : vector<4x256xbf16>, vector<4x256xbf16>, vector<4x4xf32> -> vector<4x4xf32>
    %cst_7 = arith.constant dense<0xFF800000> : vector<256xf32>
    %21 = vector.multi_reduction <maximumf>, %5, %cst_7 [0] : vector<4x256xf32> to vector<256xf32>
    %22 = vector.shape_cast %21 : vector<256xf32> to vector<1x256xf32>
    %23 = vector.broadcast %22 : vector<1x256xf32> to vector<4x256xf32>
    %24 = arith.subf %5, %23 : vector<4x256xf32>
    %25 = math.exp %24 : vector<4x256xf32>
    %cst_8 = arith.constant dense<0.000000e+00> : vector<256xf32>
    %26 = vector.multi_reduction <add>, %25, %cst_8 [0] : vector<4x256xf32> to vector<256xf32>
    %27 = vector.shape_cast %26 : vector<256xf32> to vector<1x256xf32>
    %28 = tpu.reciprocal %27 {approx = true} : vector<1x256xf32> -> vector<1x256xf32>
    %29 = vector.broadcast %28 : vector<1x256xf32> to vector<4x256xf32>
    %30 = arith.mulf %25, %29 : vector<4x256xf32>
    %31 = arith.truncf %20 : vector<4x4xf32> to vector<4x4xbf16>
    %32 = arith.truncf %30 : vector<4x256xf32> to vector<4x256xbf16>
    %cst_9 = arith.constant dense<0.000000e+00> : vector<4x256xf32>
    %33 = tpu.matmul %31, %32, %cst_9 {dimension_numbers = #tpu.dot_dimension_numbers<[1], [0], [0], [1], [0, 0, 1, 1], [], []>} : vector<4x4xbf16>, vector<4x256xbf16>, vector<4x256xf32> -> vector<4x256xf32>
    %34 = vector.extract_strided_slice %1 {offsets = [0, 0], sizes = [4, 256], strides = [1, 1]} : vector<5x256xf32> to vector<4x256xf32>
    %35 = arith.addf %34, %33 : vector<4x256xf32>
    %cst_10 = arith.constant 0.000000e+00 : f32
    %36 = vector.broadcast %cst_10 : f32 to vector<4x256xf32>
    %37 = arith.cmpf oge, %35, %36 : vector<4x256xf32>
    %cst_11 = arith.constant 1.000000e-01 : f32
    %38 = vector.broadcast %cst_11 : f32 to vector<4x256xf32>
    %39 = arith.mulf %38, %35 : vector<4x256xf32>
    %40 = arith.select %37, %35, %39 : vector<4x256xi1>, vector<4x256xf32>
    %c0_12 = arith.constant 0 : index
    %c0_13 = arith.constant 0 : index
    %c0_14 = arith.constant 0 : index
    %41 = vector.load %arg3[%c0_12, %c0_13, %c0_14] : memref<1x4x256xf32, #tpu.memory_space<vmem>>, vector<1x4x256xf32>
    %42 = vector.shape_cast %41 : vector<1x4x256xf32> to vector<4x256xf32>
    %43 = vector.shape_cast %40 : vector<4x256xf32> to vector<1x4x256xf32>
    tpu.vector_store %arg3[%c0_12, %c0_13, %c0_14], %43 {strides = array<i32>} : memref<1x4x256xf32, #tpu.memory_space<vmem>>, vector<1x4x256xf32>,
    return
  }
  func.func @transform_0(%arg0: i32) -> (i32, i32, i32) {
    %c0_i32 = arith.constant 0 : i32
    %c0_i32_0 = arith.constant 0 : i32
    %c0_i32_1 = arith.constant 0 : i32
    return %arg0, %c0_i32, %c0_i32_0 : i32, i32, i32
  }
  func.func @transform_1(%arg0: i32) -> (i32, i32) {
    %c0_i32 = arith.constant 0 : i32
    %c0_i32_0 = arith.constant 0 : i32
    %c0_i32_1 = arith.constant 0 : i32
    return %c0_i32, %c0_i32_0 : i32, i32
  }
  func.func @transform_2(%arg0: i32) -> (i32, i32, i32) {
    %c0_i32 = arith.constant 0 : i32
    %c0_i32_0 = arith.constant 0 : i32
    %c0_i32_1 = arith.constant 0 : i32
    return %arg0, %c0_i32, %c0_i32_0 : i32, i32, i32
  }
}

</mosaic_0001>

<bundles_post_ra>
// kernel: tpu_custom_call.1
= control target key start
LH: loop header
LB: loop body
LE: loop exit
PB: predicated region body
PF: predicated region fallthrough
CT: control target
= control target key end

     0   :  { %7 = vsyncpa [#allocation3], 0  ;;  %s690_s0 = inlined_call_operand.vmem [shape: f32[2,5,256], index: 0, kind: input, shape index: {}]   ;;  %s691_s1 = inlined_call_operand.vmem [shape: bf16[12,5], index: 1, kind: input, shape index: {}]   ;;  %s692_s2 = inlined_call_operand.hbm [shape: f32[2,4,256], index: 2, kind: output, shape index: {}]  }
   0x1   :  { %9 = vsyncpa [#allocation3 + $0x1], 0  ;;  %s577_s9 = smov 0   ;;  %s579_s10 = smov 0  }
   0x2   :  { %s581_s11 = smov 0   ;;  %s583_s12 = smov 0  }
   0x3 LB: > { %s598_s13 = sadd.s32 4294967295, %s559_s12   ;;  %s420_s14 = sadd.s32 4294967294, %s559_s12   ;;  %s559_s12 = sphi %s583_s12, %s698_s12   ;;  %s555_s11 = sphi %s581_s11, %s697_s11   ;;  %s551_s10 = sphi %s579_s10, %s696_s10   ;;  %s547_s9 = sphi %s577_s9, %s695_s9  }
   0x4   : > { %s602_s15 = sadd.s32 1, %s559_s12   ;;  %s69_s16 = sadd.s32 1, %s555_s11 }
   0x5   : > { %s66_s17 = ssub.s32 %s559_s12, %s602_s15  ;;  %p79_p0 = scmp.ne.s32.totalorder %s555_s11, %s551_s10 }
   0x6   : > { %p67_p1 = scmp.eq.s32.totalorder %s66_s17, 0  ;;  %p80_p2 = scmp.eq.s32.totalorder %s598_s13, 1 }
   0x7   : > { %p85_p3 = scmp.ne.s32.totalorder %s551_s10, %s547_s9  ;;  %p86_p4 = scmp.eq.s32.totalorder %s420_s14, 1 }
   0x8   : > { %s613_s18 = scalar_select %p67_p1, %s555_s11, %s69_s16  }
   0x9   : > { %p615_p5 = por %p80_p2, %p79_p0  ;;  %p619_p6 = por %p86_p4, %p85_p3 }
   0xa   : > { %p423_p7 = scmp.ge.s32.totalorder %s559_s12, 1  ;;  %p115_p8 = scmp.lt.s32.totalorder %s559_s12, 3 }
   0xc   : > { %p116_p9 = pnand %p423_p7, %p115_p8 }
   0xd   : > { %p137_p10 = scmp.lt.s32.totalorder (!%p116_p9), %s598_s13, 1  ;;  %s134_s30 = sand.u32 (!%p116_p9), 1, %s551_s10  }
   0xe   : > { %119 = sbr.rel (%p116_p9) target bundleno = 700 (0x2bc), region = 28  ;;  %s424_s3 = sshll.u32 (!%p116_p9), %s134_s30, 3 }
   0xf   : > { %s442_s4 = sshll.u32 (!%p116_p9), %s598_s13, 3  ;;  %s136_s8 = scalar_lea.vmem (!%p116_p9), [#allocation2], %s424_s3 }
  0x10   : > { %s356_s7 = scalar_lea.hbm (!%p116_p9), %s692_s2, %s442_s4  ;;  %s358_s14 = sshll.u32 (!%p116_p9), %s136_s8, 4  ;;  %s359_s14 = int_to_ptr.vmem [resolvable:$true] %s358_s14 }
  0x11   : > { %s360_s16 = sshll.u32 (!%p116_p9), %s356_s7, 4  ;;  %s517_s24 = scalar_lea.hbm (!%p116_p9), %s692_s2, 16  ;;  %s361_s16 = int_to_ptr.hbm [resolvable:$true] %s360_s16 }
  0x12   : > { %s511_s17 = sshra.s32 (!%p116_p9), %s361_s16, 4  ;;  %s512_s17 = int_to_ptr.hbm [resolvable:$true] %s511_s17 }
  0x13   : > { %vm158_vm0 = vcmask 1041408   ;;  %s138_s21 = scalar_select %p137_p10, %s598_s13, 1  ;;  %vm159_vm1 = vcmask 1042432   ;;  %v561_v0 = vmov 65535   ;;  %v429_v7 = vld [vmem:[%s691_s1] sm:$0xf] }
  0x14   : > { %v160_v1 = vsel %vm158_vm0, 4294967295, %v561_v0  ;;  %v441_v8 = vld [vmem:[%s691_s1] sm:$0x30]  ;;  %vm154_vm2 = vcmask 39936   ;;  %vm252_vm3 = vcmask 1043456   ;;  %vm196_vm4 = vcmask 1047556   ;;  %p518_p0 = scmp.lt.s32.totalorder %s512_s17, %s692_s2 }
  0x15   : > { %s440_s22 = sshll.u32 %s138_s21, 4  ;;  %v161_v3 = vsel %vm159_vm1, %v160_v1, 0  ;;  %v430_v11 = vor.u32 %v441_v8, %v429_v7  ;;  %vm294_vm5 = vcmask 31744   ;;  %s345_s13 = scalar_lea.sflag [#allocation3], %s134_s30 }
  0x16   : > { %s141_s25 = scalar_lea.vmem %s690_s0, %s440_s22  ;;  %s513_s21 = scalar_lea.hbm %s512_s17, 8 }
  0x17   : > { %v631_v2 = vld [vmem:[%s141_s25] sm:$0x1f]  ;;  %v633_v4 = vld [vmem:[%s141_s25 + $0x8] sm:$0x1f]  ;;  %p514_p11 = scmp.ne.s32.totalorder %s512_s17, %s513_s21  ;;  %p519_p1 = scmp.lt.s32.totalorder %s517_s24, %s513_s21 }
  0x18   : > { %v147_v5 = vpack.c.bf16 %v631_v2, %v631_v2  ;;  %v148_v6 = vpack.c.bf16 %v633_v4, %v633_v4 }
  0x19   : > { %p515_p12 = pnand %p514_p11, %p615_p5  ;;  %p520_p2 = por %p519_p1, %p518_p0 }
  0x1a   : > { %v163_v9 = vand.u32 %v161_v3, %v147_v5  ;;  %v166_v10 = vand.u32 %v161_v3, %v148_v6 }
  0x1b   : > { %p516_p13 = pneg %p515_p12 }
  0x1c   : > { %175 = vmatpush.bf16.msra.mxu0 %v163_v9  ;;  %189 = vmatpush.bf16.msra.mxu1 %v166_v10 }
  0x1d   : > { %p521_p3 = pnand %p520_p2, %p516_p13 }
  0x1f   : > { %431 = vmatmul.msk.bf16.vlgmr.msra.gmra.mxu0 %vm154_vm2, %v430_v11  ;;  %432 = vmatmul.msk.bf16.vlgmr.msra.gmra.mxu1 %vm154_vm2, %v430_v11 }
  0x9c   : > { %v177_v12 = vpop.f32.mrf.mxu0  ;;  %v191_v13 = vpop.f32.mrf.mxu1 }
  0x9d   : > { %v253_v14 = vsel %vm252_vm3, %v177_v12, -inf  ;;  %v260_v15 = vsel %vm252_vm3, %v191_v13, -inf  ;;  %v197_v16 = vsel %vm196_vm4, %v177_v12, -inf  ;;  %v198_v17 = vsel %vm196_vm4, %v191_v13, -inf }
  0x9e   : > { %v254_v18 = vrot.slane %v253_v14, 4  ;;  %v261_v19 = vrot.slane %v260_v15, 4  ;;  %v199_v20 = vmax.f32 %v197_v16, %v198_v17 }
  0xa0   : > { %v255_v21 = vmax.f32 %v253_v14, %v254_v18  ;;  %v262_v22 = vmax.f32 %v260_v15, %v261_v19  ;;  %200 = vmax.xlane.f32.xlu0 %v199_v20 }
  0xa2   : > { %v256_v23 = vrot.slane %v255_v21, 2  ;;  %v263_v24 = vrot.slane %v262_v22, 2 }
  0xa4   : > { %v257_v25 = vmax.f32 %v255_v21, %v256_v23  ;;  %v264_v26 = vmax.f32 %v262_v22, %v263_v24  ;;  %v179_v15 = vpop.f32.mrf.mxu0  ;;  %v193_v16 = vpop.f32.mrf.mxu1 }
  0xa5   : > { %v216_v17 = vpack.c.bf16 %v179_v15, %v179_v15  ;;  %v217_v18 = vpack.c.bf16 %v193_v16, %v193_v16 }
  0xa6   : > { %v258_v27 = vrot.slane %v257_v25, 1  ;;  %v265_v28 = vrot.slane %v264_v26, 1 }
  0xa8   : > { %v259_v29 = vmax.f32 %v257_v25, %v258_v27  ;;  %v266_v30 = vmax.f32 %v264_v26, %v265_v28 }
  0xaa   : > { %v267_v31 = vsub.f32 %v177_v12, %v259_v29  ;;  %v268_v32 = vsub.f32 %v191_v13, %v266_v30 }
  0xac   : > { %v269_v33 = vmul.f32 1.442695, %v267_v31  ;;  %v271_v34 = vmul.f32 1.442695, %v268_v32 }
  0xae   : > { %483 = vpow2.f32 %v269_v33 }
  0xaf   : > { %485 = vpow2.f32 %v271_v34 }
  0xb4   : > { %v484_v35 = vpop.eup %483 }
  0xb5   : > { %v486_v36 = vpop.eup %485  ;;  %v273_v37 = vsel %vm252_vm3, %v484_v35, 0.0 }
  0xb6   : > { %v274_v38 = vrot.slane %v273_v37, 4  ;;  %v280_v39 = vsel %vm252_vm3, %v486_v36, 0.0 }
  0xb7   : > { %v281_v40 = vrot.slane %v280_v39, 4 }
  0xb8   : > { %v275_v41 = vadd.f32 %v274_v38, %v273_v37 }
  0xb9   : > { %v282_v42 = vadd.f32 %v281_v40, %v280_v39 }
  0xba   : > { %v276_v43 = vrot.slane %v275_v41, 2 }
  0xbb   : > { %v283_v44 = vrot.slane %v282_v42, 2 }
  0xbc   : > { %v277_v45 = vadd.f32 %v276_v43, %v275_v41 }
  0xbd   : > { %v284_v46 = vadd.f32 %v283_v44, %v282_v42 }
  0xbe   : > { %v278_v47 = vrot.slane %v277_v45, 1 }
  0xbf   : > { %v285_v48 = vrot.slane %v284_v46, 1 }
  0xc0   : > { %v279_v49 = vadd.f32 %v278_v47, %v277_v45 }
  0xc1   : > { %v286_v50 = vadd.f32 %v285_v48, %v284_v46 }
  0xc2   : > { %487 = vrcp.f32 %v279_v49 }
  0xc3   : > { %489 = vrcp.f32 %v286_v50 }
  0xc8   : > { %v488_v51 = vpop.eup %487 }
  0xc9   : > { %v490_v52 = vpop.eup %489  ;;  %v289_v53 = vmul.f32 %v488_v51, %v484_v35 }
  0xca   : > { %v290_v54 = vmul.f32 %v490_v52, %v486_v36 }
  0xcb   : > { %v292_v55 = vpack.c.bf16 %v289_v53, %v289_v53 }
  0xcc   : > { %v293_v56 = vpack.c.bf16 %v290_v54, %v290_v54 }
  0xcd   : > { %v299_v57 = vsel %vm158_vm0, %v292_v55, 0 }
  0xce   : > { %311 = vmatpush.bf16.msrb.mxu0 %v299_v57  ;;  %v302_v58 = vsel %vm158_vm0, %v293_v56, 0 }
  0xcf   : > { %324 = vmatpush.bf16.msrb.mxu1 %v302_v58 }
 0x113   : > { %v201_v59 = vpop.xlane.xlu0 %200 }
 0x114   : > { %v202_v60 = vsub.f32 %v177_v12, %v201_v59  ;;  %v203_v61 = vsub.f32 %v191_v13, %v201_v59 }
 0x116   : > { %v204_v62 = vmul.f32 1.442695, %v202_v60  ;;  %v206_v63 = vmul.f32 1.442695, %v203_v61 }
 0x118   : > { %491 = vpow2.f32 %v204_v62 }
 0x119   : > { %493 = vpow2.f32 %v206_v63 }
 0x11e   : > { %v492_v0 = vpop.eup %491 }
 0x11f   : > { %v494_v1 = vpop.eup %493  ;;  %v208_v3 = vsel %vm196_vm4, %v492_v0, 0.0 }
 0x120   : > { %v209_v5 = vsel %vm196_vm4, %v494_v1, 0.0 }
 0x121   : > { %v210_v6 = vadd.f32 %v209_v5, %v208_v3 }
 0x123   : > { %211 = vadd.xlane.f32.xlu0 %v210_v6 }
 0x196   : > { %v212_v7 = vpop.xlane.xlu0 %211 }
 0x197   : > { %495 = vrcp.f32 %v212_v7 }
 0x19d   : > { %v496_v8 = vpop.eup %495 }
 0x19e   : > { %v214_v9 = vmul.f32 %v496_v8, %v492_v0  ;;  %v215_v10 = vmul.f32 %v496_v8, %v494_v1 }
 0x1a0   : > { %v218_v11 = vpack.c.bf16 %v214_v9, %v214_v9  ;;  %v219_v12 = vpack.c.bf16 %v215_v10, %v215_v10 }
 0x1a2   : > { %v222_v13 = vrot.slane %v218_v11, 2  ;;  %v223_v14 = vrot.slane %v219_v12, 2 }
 0x1a4   : > { %233 = vmatpush.bf16.xpose.msra.mxu2 %v222_v13  ;;  %246 = vmatpush.bf16.xpose.msra.mxu3 %v223_v14 }
 0x1ab   : > { %234 = vmatmul.bf16.vlgmr.msra.gmra.mxu2 %v216_v17  ;;  %247 = vmatmul.bf16.vlgmr.msra.gmra.mxu3 %v217_v18 }
 0x22e   : > { %v235_v19 = vpop.f32.mrf.mxu2  ;;  %v248_v20 = vpop.f32.mrf.mxu3 }
 0x22f   : > { %v249_v21 = vadd.f32 %v248_v20, %v235_v19 }
 0x231   : > { %v291_v22 = vpack.c.bf16 %v249_v21, %v249_v21 }
 0x233   : > { %433 = vmatmul.msk.bf16.vlgmr.msrb.gmra.mxu0 %vm294_vm5, %v291_v22  ;;  %434 = vmatmul.msk.bf16.vlgmr.msrb.gmra.mxu1 %vm294_vm5, %v291_v22 }
 0x236   : > { %v237_v23 = vpop.f32.mrf.mxu2  ;;  %v250_v24 = vpop.f32.mrf.mxu3 }
 0x2b0   : > { %v313_v25 = vpop.f32.mrf.mxu0  ;;  %v326_v26 = vpop.f32.mrf.mxu1 }
 0x2b1   : > { %v330_v27 = vadd.f32 %v313_v25, %v631_v2  ;;  %v331_v28 = vadd.f32 %v326_v26, %v633_v4 }
 0x2b3   : > { %v334_v29 = vmul.f32 0.1, %v330_v27  ;;  %vm333_vm6 = vcmp.ge.f32.partialorder %v331_v28, 0.0  ;;  %v335_v30 = vmul.f32 0.1, %v331_v28  ;;  %vm332_vm7 = vcmp.ge.f32.partialorder %v330_v27, 0.0 }
 0x2b5   : > { %v337_v31 = vsel %vm333_vm6, %v331_v28, %v335_v30  ;;  %v336_v33 = vsel %vm332_vm7, %v330_v27, %v334_v29 }
 0x2b6   : > { %v340_v32 = vrot.slane %v337_v31, 4 }
 0x2b8   : > { %v315_v2 = vpop.f32.mrf.mxu0  ;;  %v328_v34 = vpop.f32.mrf.mxu1  ;;  %v341_v4 = vsel %vm252_vm3, %v336_v33, %v340_v32 }
 0x2b9   : > { %343 = vst [vmem:[%s136_s8] sm:$0xff] %v341_v4 }
 0x2ba   : > { %524 = shalt.err (!%p521_p3)
}
 0x2bb   : > { %443 = dma.vmem_to_hbm [thread:$0]  (%p615_p5), %s359_s14, 128, %s361_s16, %s345_s13  }
 0x2bc PF: > { %p449_p4 = scmp.ge.s32.totalorder %s559_s12, 2  ;;  %s372_s27 = sand.u32 1, %s547_s9  }
 0x2bd   : > { %s373_s28 = scalar_lea.sflag [#allocation3], %s372_s27 }
 0x2be   : > { %p446_p7 = pnand %p449_p4, %p619_p6 }
 0x2c0   : > { %p447_p8 = pneg %p446_p7 }
 0x2c2   : > { %542 = dma.done.wait (%p447_p8), %s373_s28, 128  }
 0x2c3   : > { %544 = vsyncadd (%p447_p8), %s373_s28, 4294967168  ;;  %p12_p9 = scmp.ge.s32.totalorder %s602_s15, 4   ;;  %s695_s9 = smov %s551_s10 }
 0x2c4   : > { %s696_s10 = smov %s555_s11  ;;  %s697_s11 = smov %s613_s18 }
 0x2c5   : > { %s698_s12 = smov %s602_s15  ;;  %14 = sbr.rel (!%p12_p9) target bundleno = 3 (0x3), region = 63 }
 0x2ca   :  { %379 = vsyncpa [#allocation3], 1 }
 0x2cb   :  { %381 = vsyncpa [#allocation3 + $0x1], 1 }

</bundles_post_ra>
